<compile_context>
chip_gen: v7x
topology: tpu7x:2x2x1
jax: 0.10.0
libtpu: 0.0.40
codegen_flags: <defaults>
</compile_context>

<pallas_src>
import jax
import jax.numpy as jnp
from jax.experimental import pallas as pl
from jax.experimental.pallas import tpu as pltpu


# --------------------------------------------------------------------------------------
# Kernel
# --------------------------------------------------------------------------------------
def _moe_grouped_kernel(tile_expert_ref,   # SMEM [num_tiles] int32 (scalar prefetch)
                        tile_valid_ref,    # SMEM [num_tiles] int32 (scalar prefetch)
                        x_ref,             # VMEM [TM, H]          routed activation rows
                        w13_ref,           # VMEM [1, 1, H, 2*TI]  fused (gate | up) block
                        w2_ref,            # VMEM [1, 1, TI, H]    down-proj block
                        rw_ref,            # VMEM [TM, 1] f32      per-row routing weight
                        o_ref,             # VMEM [TM, H]          output (hidden dtype)
                        acc_ref):          # VMEM scratch [TM, H] f32
    t = pl.program_id(0)                   # token-tile index (outer, "parallel")
    i = pl.program_id(1)                   # intermediate-block index (inner, "arbitrary")
    n_i = pl.num_programs(1)
    ti = w2_ref.shape[2]

    # MXU compute dtype: bf16/fp16 weights run at native rate; accumulation stays f32.
    # (int8/fp8 weights would need scales -> guarded in prepare_moe_weights.)
    w_dtype = w13_ref.dtype
    if jnp.issubdtype(w_dtype, jnp.floating) and jnp.dtype(w_dtype).itemsize <= 2:
        compute_dtype = w_dtype
    else:
        compute_dtype = jnp.float32

    @pl.when(tile_valid_ref[t] != 0)       # skip all compute on trailing padding tiles
    def _compute():
        @pl.when(i == 0)
        def _init():
            acc_ref[...] = jnp.zeros_like(acc_ref)

        x = x_ref[...].astype(compute_dtype)                                   # [TM, H]
        # Fused gate+up projection: single MXU call, weights pre-laid-out as [H, 2*TI].
        gu = jnp.dot(x, w13_ref[0, 0], preferred_element_type=jnp.float32)     # [TM, 2*TI]
        gate = gu[:, :ti]
        up = gu[:, ti:]
        act = gate * jax.nn.sigmoid(gate) * up                                 # silu(g)*u, f32

        # Down projection for this intermediate block, f32 accumulation.
        acc_ref[...] += jnp.dot(act.astype(compute_dtype), w2_ref[0, 0],
                                preferred_element_type=jnp.float32)            # [TM, H]

        @pl.when(i == n_i - 1)
        def _finalize():
            o_ref[...] = (rw_ref[...] * acc_ref[...]).astype(o_ref.dtype)


# --------------------------------------------------------------------------------------
# Helpers
# --------------------------------------------------------------------------------------
def _physical_vmem_bytes():
    try:
        return int(pltpu.get_tpu_info().vmem_capacity_bytes)
    except Exception:
        return 64 << 20                    # conservative (v7x per-TC VMEM)


def _default_ti(I, H, w_itemsize, phys_vmem):
    """Largest intermediate tile whose double-buffered weight blocks fit ~half of VMEM."""
    budget = phys_vmem // 2

    def weight_footprint(ti):
        # double-buffered w13 (H x 2ti) + w2 (ti x H) blocks
        return 2 * (H * 2 * ti + ti * H) * w_itemsize

    if weight_footprint(I) <= budget:
        return I                           # full expert resident -> cross-tile weight reuse
    for cand in (1024, 512, 256, 128):
        if I % cand == 0 and weight_footprint(cand) <= budget:
            return cand
    return 128 if I % 128 == 0 else I


def prepare_moe_weights(w13_weight, w2_weight, *, ti=None, weight_dtype=jnp.bfloat16):
    """One-time (load-time) weight re-layout + low-precision cast.

    w13_weight: [E, 2I, H] (gate rows first, up rows second), w2_weight: [E, H, I].
    Returns (w13_blocks [E, nI, H, 2*TI], w2_blocks [E, nI, TI, H]) in `weight_dtype`.
    """
    E, two_I, H = w13_weight.shape
    I = two_I // 2
    assert w2_weight.shape == (E, H, I)
    assert jnp.issubdtype(jnp.dtype(weight_dtype), jnp.floating), \
        "only float weight dtypes supported (int8/fp8 need scales)"

    if ti is None:
        ti = _default_ti(I, H, jnp.dtype(weight_dtype).itemsize, _physical_vmem_bytes())
    assert I % ti == 0, "ti must divide the intermediate size"
    assert ti == I or ti % 128 == 0, "ti must be lane-aligned (multiple of 128) or equal I"
    n_i = I // ti

    w1 = w13_weight[:, :I, :].astype(weight_dtype)                        # [E, I, H] gate
    w3 = w13_weight[:, I:, :].astype(weight_dtype)                        # [E, I, H] up
    w1b = w1.reshape(E, n_i, ti, H).transpose(0, 1, 3, 2)                 # [E, nI, H, TI]
    w3b = w3.reshape(E, n_i, ti, H).transpose(0, 1, 3, 2)                 # [E, nI, H, TI]
    w13b = jnp.concatenate([w1b, w3b], axis=-1)                           # [E, nI, H, 2*TI]
    w2b = w2_weight.astype(weight_dtype).transpose(0, 2, 1).reshape(E, n_i, ti, H)
    return w13b, w2b


# --------------------------------------------------------------------------------------
# Forward
# --------------------------------------------------------------------------------------
def fused_moe_forward(hidden_states, topk_weights, topk_ids, w13_blocks, w2_blocks, *,
                      tm=256):
    """Grouped-GEMM fused MoE forward (silu).  Returns [T, H] in hidden_states.dtype.

    hidden_states: [T, H]; topk_weights/topk_ids: [T, K].
    w13_blocks/w2_blocks: pre-laid-out weights from prepare_moe_weights().
    tm: rows per token tile (multiple of 8). 256-512 for prefill on v6e/v7x, 128-256 on
        v5e, 32-64 for decode-sized batches.
    """
    T, H = hidden_states.shape
    E, n_i, ti, H2 = w2_blocks.shape
    assert H2 == H
    assert w13_blocks.shape == (E, n_i, H, 2 * ti)
    I = n_i * ti
    K = topk_ids.shape[1]
    M = T * K
    assert tm % 8 == 0, "tm must be a multiple of 8 (sublane)"

    w_bytes = jnp.dtype(w13_blocks.dtype).itemsize
    if jnp.issubdtype(w13_blocks.dtype, jnp.floating) and w_bytes <= 2:
        act_dtype = w13_blocks.dtype       # stream x at the low-precision weight dtype
    else:
        act_dtype = hidden_states.dtype
    out_dtype = hidden_states.dtype        # bf16 output for bf16 models (halves writeback)

    # ---------------- routing metadata (plain XLA, outside the kernel) ----------------
    expert_flat = topk_ids.reshape(-1).astype(jnp.int32)                   # [M]
    token_flat = jnp.repeat(jnp.arange(T, dtype=jnp.int32), K)             # [M]
    weight_flat = topk_weights.reshape(-1).astype(jnp.float32)             # [M]

    counts = jnp.bincount(expert_flat, length=E).astype(jnp.int32)         # [E]
    padded_counts = ((counts + tm - 1) // tm) * tm                         # [E]
    ends = jnp.cumsum(padded_counts).astype(jnp.int32)                     # [E]
    starts = ends - padded_counts                                          # [E]

    order = jnp.argsort(expert_flat)                                       # [M]
    sorted_expert = expert_flat[order]
    csum_counts = jnp.cumsum(counts).astype(jnp.int32)
    sorted_group_start = (csum_counts - counts)[sorted_expert]             # [M]
    rank_in_group = jnp.arange(M, dtype=jnp.int32) - sorted_group_start
    padded_row_sorted = starts[sorted_expert] + rank_in_group              # [M]
    padded_row = jnp.zeros((M,), jnp.int32).at[order].set(padded_row_sorted)

    # Static upper bound on padded rows: ceil(M/tm) full tiles + <=1 partial tile/expert.
    num_tiles = (M + tm - 1) // tm + E
    P = num_tiles * tm

    x_rows = hidden_states.astype(act_dtype)[token_flat]                   # [M, H] gather
    x_padded = jnp.zeros((P, H), act_dtype).at[padded_row].set(x_rows)
    rw_padded = jnp.zeros((P, 1), jnp.float32).at[padded_row, 0].set(weight_flat)

    # Per-tile expert id + valid flag (SMEM scalar-prefetch tables).
    tile_start = jnp.arange(num_tiles, dtype=jnp.int32) * tm
    raw = jnp.sum(tile_start[:, None] >= ends[None, :], axis=1).astype(jnp.int32)
    last_used = jnp.max(jnp.where(counts > 0, jnp.arange(E, dtype=jnp.int32), 0))
    tile_valid = (tile_start < ends[E - 1]).astype(jnp.int32)
    # Invalid trailing tiles point at the last used expert -> no extra weight DMA.
    tile_expert = jnp.where(tile_valid == 1, raw, last_used).astype(jnp.int32)

    # ---------------- index maps ----------------
    # For invalid tiles, pin the intermediate-block index to the block already resident
    # from the last valid tile, so padding tiles issue zero weight DMAs.
    def _w_block_i(i, te, tv, t):
        v = tv[t]
        return v * i + (1 - v) * (n_i - 1)

    def w13_map(t, i, te, tv):
        return (te[t], _w_block_i(i, te, tv, t), 0, 0)

    def w2_map(t, i, te, tv):
        return (te[t], _w_block_i(i, te, tv, t), 0, 0)

    # ---------------- VMEM budget & cost estimate ----------------
    x_bytes = jnp.dtype(act_dtype).itemsize
    out_bytes = jnp.dtype(out_dtype).itemsize
    vmem_needed = (2 * tm * H * x_bytes                 # x blocks (double-buffered)
                   + 2 * (H * 2 * ti + ti * H) * w_bytes  # w13 + w2 blocks
                   + 2 * tm * 128 * 4                   # rw (lane-padded)
                   + 2 * tm * H * out_bytes             # out blocks
                   + tm * H * 4                         # acc scratch
                   + 2 * tm * 2 * ti * 4                # gu/act intermediates
                   + (4 << 20))                         # Mosaic internal scratch margin
    phys = _physical_vmem_bytes()
    vmem_limit = int(min(max(vmem_needed, 32 << 20), int(phys * 0.9)))

    cost = pl.CostEstimate(
        flops=int(6 * P * I * H),
        transcendentals=int(P * I),
        bytes_accessed=int(num_tiles * n_i * 3 * ti * H * w_bytes
                           + P * H * (x_bytes + out_bytes) + P * 4),
    )

    out_padded = pl.pallas_call(
        _moe_grouped_kernel,
        out_shape=jax.ShapeDtypeStruct((P, H), out_dtype),
        grid_spec=pltpu.PrefetchScalarGridSpec(
            num_scalar_prefetch=2,
            grid=(num_tiles, n_i),
            in_specs=[
                pl.BlockSpec((tm, H), lambda t, i, te, tv: (t, 0)),         # x rows
                pl.BlockSpec((1, 1, H, 2 * ti), w13_map),                   # w13 block
                pl.BlockSpec((1, 1, ti, H), w2_map),                        # w2 block
                pl.BlockSpec((tm, 1), lambda t, i, te, tv: (t, 0)),         # routing w
            ],
            out_specs=pl.BlockSpec((tm, H), lambda t, i, te, tv: (t, 0)),
            scratch_shapes=[pltpu.VMEM((tm, H), jnp.float32)],
        ),
        compiler_params=pltpu.CompilerParams(
            dimension_semantics=("parallel", "arbitrary"),
            vmem_limit_bytes=vmem_limit,
        ),
        cost_estimate=cost,
    )(tile_expert, tile_valid, x_padded, w13_blocks, w2_blocks, rw_padded)

    # Combine the K expert contributions per token (padding rows are never gathered back).
    out_rows = out_padded[padded_row]                                      # [M, H]
    out = jnp.zeros((T, H), out_dtype).at[token_flat].add(out_rows)
    return out


# --------------------------------------------------------------------------------------
# Reference (plain JAX) — mirrors the bf16 weight/activation streaming of the kernel
# --------------------------------------------------------------------------------------
def _reference_bf16(hidden_states, topk_weights, topk_ids, w13_weight, w2_weight):
    E, two_I, H = w13_weight.shape
    I = two_I // 2
    f32 = jnp.float32
    x = hidden_states.astype(jnp.bfloat16).astype(f32)
    w1 = w13_weight[:, :I, :].astype(jnp.bfloat16).astype(f32)
    w3 = w13_weight[:, I:, :].astype(jnp.bfloat16).astype(f32)
    w2 = w2_weight.astype(jnp.bfloat16).astype(f32)
    gate = jnp.einsum("th,eih->eti", x, w1)
    up = jnp.einsum("th,eih->eti", x, w3)
    act = gate * jax.nn.sigmoid(gate) * up
    act = act.astype(jnp.bfloat16).astype(f32)            # kernel downcasts act for MXU
    out_e = jnp.einsum("eti,ehi->eth", act, w2)                            # [E, T, H]
    onehot = (topk_ids[None, :, :] == jnp.arange(E)[:, None, None]).astype(f32)
    routing = jnp.sum(onehot * topk_weights.astype(f32)[None, :, :], axis=-1)
    return jnp.einsum("et,eth->th", routing, out_e)


# --------------------------------------------------------------------------------------
# Demo
# --------------------------------------------------------------------------------------
if __name__ == "__main__":
    # Small shapes consistent with FusedMoE.__init__ / UnquantizedFusedMoEMethod weights.
    num_experts = 8          # E
    top_k = 2                # K
    hidden_size = 128        # H
    intermediate_size = 128  # I
    num_tokens = 32          # T

    key = jax.random.PRNGKey(0)
    k_x, k_w13, k_w2, k_logits = jax.random.split(key, 4)

    hidden_states = jax.random.normal(k_x, (num_tokens, hidden_size), jnp.float32)
    w13_weight = 0.1 * jax.random.normal(
        k_w13, (num_experts, 2 * intermediate_size, hidden_size), jnp.float32)
    w2_weight = 0.1 * jax.random.normal(
        k_w2, (num_experts, hidden_size, intermediate_size), jnp.float32)

    # Synthetic router (StandardTopKOutput): softmax top-k, renormalized.
    router_logits = jax.random.normal(k_logits, (num_tokens, num_experts), jnp.float32)
    probs = jax.nn.softmax(router_logits, axis=-1)
    topk_weights, topk_ids = jax.lax.top_k(probs, top_k)
    topk_weights = (topk_weights / jnp.sum(topk_weights, axis=-1, keepdims=True)).astype(jnp.float32)
    topk_ids = topk_ids.astype(jnp.int32)

    # Weight re-layout + bf16 cast done ONCE at weight-load time (hoisted out of forward).
    w13_blocks, w2_blocks = prepare_moe_weights(w13_weight, w2_weight,
                                                weight_dtype=jnp.bfloat16)
    w13_blocks, w2_blocks = jax.block_until_ready((w13_blocks, w2_blocks))

    fused_moe = jax.jit(fused_moe_forward, static_argnames=("tm",))
    out = fused_moe(hidden_states, topk_weights, topk_ids, w13_blocks, w2_blocks, tm=32)
    out = jax.block_until_ready(out)

    ref = _reference_bf16(hidden_states, topk_weights, topk_ids, w13_weight, w2_weight)
    assert out.shape == (num_tokens, hidden_size)
    out_f32 = out.astype(jnp.float32)
    err = jnp.max(jnp.abs(out_f32 - ref))
    assert jnp.allclose(out_f32, ref, atol=1e-2, rtol=1e-2), f"max abs err = {err}"
    print("KERNEL_OK")
</pallas_src>

<mosaic_0001>
module attributes {stable_mosaic.version = 11 : i64} {
  func.func private @main(%arg0: i32) attributes {dimension_semantics = [#tpu.dimension_semantics<core_parallel>], iteration_bounds = array<i64: 2>, tpu.core_type = #tpu.core_type<sc_scalar_subcore>, window_params = []} {
    return
  }
}

module attributes {stable_mosaic.version = 11 : i64} {
  func.func private @main(%arg0: i32) attributes {dimension_semantics = [#tpu.dimension_semantics<core_parallel>], iteration_bounds = array<i64: 2>, tpu.core_type = #tpu.core_type<sc_scalar_subcore>, window_params = []} {
    return
  }
}

module attributes {stable_mosaic.version = 11 : i64} {
  func.func @_moe_grouped_kernel(%arg0: i32, %arg1: i32, %arg2: memref<10xi32, #tpu.memory_space<smem>>, %arg3: memref<10xi32, #tpu.memory_space<smem>>, %arg4: memref<32x128xbf16, #tpu.memory_space<vmem>>, %arg5: memref<1x1x128x256xbf16, #tpu.memory_space<vmem>>, %arg6: memref<1x1x128x128xbf16, #tpu.memory_space<vmem>>, %arg7: memref<32x1xf32, #tpu.memory_space<vmem>>, %arg8: memref<32x128xf32, #tpu.memory_space<vmem>>, %arg9: memref<32x128xf32, #tpu.memory_space<vmem>>) attributes {dimension_semantics = [#tpu.dimension_semantics<parallel>, #tpu.dimension_semantics<arbitrary>], iteration_bounds = array<i64: 10, 1>, scalar_prefetch = 2 : i64, scratch_operands = 1 : i64, tpu.core_type = #tpu.core_type<tc>, window_params = [{transform_indices = @transform_0, window_bounds = array<i64: 32, 128>}, {transform_indices = @transform_1, window_bounds = array<i64: 1, 1, 128, 256>}, {transform_indices = @transform_2, window_bounds = array<i64: 1, 1, 128, 128>}, {transform_indices = @transform_3, window_bounds = array<i64: 32, 1>}, {transform_indices = @transform_4, window_bounds = array<i64: 32, 128>}]} {
    %0 = arith.index_cast %arg0 : i32 to index
    %1 = memref.load %arg3[%0] : memref<10xi32, #tpu.memory_space<smem>>
    %c0_i32 = arith.constant 0 : i32
    %2 = arith.cmpi ne, %1, %c0_i32 : i32
    %3 = arith.extui %2 : i1 to i32
    %c0_i32_0 = arith.constant 0 : i32
    %4 = arith.cmpi ne, %3, %c0_i32_0 : i32
    scf.if %4 {
      %c0_i32_1 = arith.constant 0 : i32
      %5 = arith.cmpi eq, %arg1, %c0_i32_1 : i32
      %6 = arith.extui %5 : i1 to i32
      %c0_i32_2 = arith.constant 0 : i32
      %7 = arith.cmpi ne, %6, %c0_i32_2 : i32
      scf.if %7 {
        %cst_20 = arith.constant 0.000000e+00 : f32
        %31 = vector.broadcast %cst_20 : f32 to vector<32x128xf32>
        %c0_21 = arith.constant 0 : index
        %c0_22 = arith.constant 0 : index
        %32 = vector.load %arg9[%c0_21, %c0_22] : memref<32x128xf32, #tpu.memory_space<vmem>>, vector<32x128xf32>
        tpu.vector_store %arg9[%c0_21, %c0_22], %31 {strides = array<i32>} : memref<32x128xf32, #tpu.memory_space<vmem>>, vector<32x128xf32>,
      } else {
      }
      %c0 = arith.constant 0 : index
      %c0_3 = arith.constant 0 : index
      %8 = vector.load %arg4[%c0, %c0_3] : memref<32x128xbf16, #tpu.memory_space<vmem>>, vector<32x128xbf16>
      %c0_4 = arith.constant 0 : index
      %c0_5 = arith.constant 0 : index
      %c0_6 = arith.constant 0 : index
      %c0_7 = arith.constant 0 : index
      %9 = vector.load %arg5[%c0_4, %c0_5, %c0_6, %c0_7] : memref<1x1x128x256xbf16, #tpu.memory_space<vmem>>, vector<1x1x128x256xbf16>
      %10 = vector.shape_cast %9 : vector<1x1x128x256xbf16> to vector<128x256xbf16>
      %cst = arith.constant dense<0.000000e+00> : vector<32x256xf32>
      %11 = tpu.matmul %8, %10, %cst {dimension_numbers = #tpu.dot_dimension_numbers<[1], [0], [0], [1], [0, 0, 1, 1], [], []>} : vector<32x128xbf16>, vector<128x256xbf16>, vector<32x256xf32> -> vector<32x256xf32>
      %12 = vector.extract_strided_slice %11 {offsets = [0, 0], sizes = [32, 128], strides = [1, 1]} : vector<32x256xf32> to vector<32x128xf32>
      %13 = vector.extract_strided_slice %11 {offsets = [0, 128], sizes = [32, 128], strides = [1, 1]} : vector<32x256xf32> to vector<32x128xf32>
      %14 = arith.negf %12 : vector<32x128xf32>
      %15 = math.exp %14 : vector<32x128xf32>
      %cst_8 = arith.constant 1.000000e+00 : f32
      %16 = vector.broadcast %cst_8 : f32 to vector<32x128xf32>
      %17 = arith.addf %16, %15 : vector<32x128xf32>
      %18 = arith.divf %16, %17 : vector<32x128xf32>
      %19 = arith.mulf %12, %18 : vector<32x128xf32>
      %20 = arith.mulf %19, %13 : vector<32x128xf32>
      %c0_9 = arith.constant 0 : index
      %c0_10 = arith.constant 0 : index
      %21 = vector.load %arg9[%c0_9, %c0_10] : memref<32x128xf32, #tpu.memory_space<vmem>>, vector<32x128xf32>
      %22 = arith.truncf %20 : vector<32x128xf32> to vector<32x128xbf16>
      %c0_11 = arith.constant 0 : index
      %c0_12 = arith.constant 0 : index
      %c0_13 = arith.constant 0 : index
      %c0_14 = arith.constant 0 : index
      %23 = vector.load %arg6[%c0_11, %c0_12, %c0_13, %c0_14] : memref<1x1x128x128xbf16, #tpu.memory_space<vmem>>, vector<1x1x128x128xbf16>
      %24 = vector.shape_cast %23 : vector<1x1x128x128xbf16> to vector<128x128xbf16>
      %cst_15 = arith.constant dense<0.000000e+00> : vector<32x128xf32>
      %25 = tpu.matmul %22, %24, %cst_15 {dimension_numbers = #tpu.dot_dimension_numbers<[1], [0], [0], [1], [0, 0, 1, 1], [], []>} : vector<32x128xbf16>, vector<128x128xbf16>, vector<32x128xf32> -> vector<32x128xf32>
      %26 = arith.addf %21, %25 : vector<32x128xf32>
      %c0_16 = arith.constant 0 : index
      %c0_17 = arith.constant 0 : index
      %27 = vector.load %arg9[%c0_16, %c0_17] : memref<32x128xf32, #tpu.memory_space<vmem>>, vector<32x128xf32>
      tpu.vector_store %arg9[%c0_16, %c0_17], %26 {strides = array<i32>} : memref<32x128xf32, #tpu.memory_space<vmem>>, vector<32x128xf32>,
      %c0_i32_18 = arith.constant 0 : i32
      %28 = arith.cmpi eq, %arg1, %c0_i32_18 : i32
      %29 = arith.extui %28 : i1 to i32
      %c0_i32_19 = arith.constant 0 : i32
      %30 = arith.cmpi ne, %29, %c0_i32_19 : i32
      scf.if %30 {
        %c0_20 = arith.constant 0 : index
        %c0_21 = arith.constant 0 : index
        %31 = vector.load %arg7[%c0_20, %c0_21] : memref<32x1xf32, #tpu.memory_space<vmem>>, vector<32x1xf32>
        %c0_22 = arith.constant 0 : index
        %c0_23 = arith.constant 0 : index
        %32 = vector.load %arg9[%c0_22, %c0_23] : memref<32x128xf32, #tpu.memory_space<vmem>>, vector<32x128xf32>
        %33 = vector.broadcast %31 : vector<32x1xf32> to vector<32x128xf32>
        %34 = arith.mulf %33, %32 : vector<32x128xf32>
        %c0_24 = arith.constant 0 : index
        %c0_25 = arith.constant 0 : index
        %35 = vector.load %arg8[%c0_24, %c0_25] : memref<32x128xf32, #tpu.memory_space<vmem>>, vector<32x128xf32>
        tpu.vector_store %arg8[%c0_24, %c0_25], %34 {strides = array<i32>} : memref<32x128xf32, #tpu.memory_space<vmem>>, vector<32x128xf32>,
      } else {
      }
    } else {
    }
    return
  }
  func.func @transform_0(%arg0: i32, %arg1: i32, %arg2: memref<10xi32, #tpu.memory_space<smem>>, %arg3: memref<10xi32, #tpu.memory_space<smem>>) -> (i32, i32) {
    %c0_i32 = arith.constant 0 : i32
    %c0_i32_0 = arith.constant 0 : i32
    return %arg0, %c0_i32 : i32, i32
  }
  func.func @transform_1(%arg0: i32, %arg1: i32, %arg2: memref<10xi32, #tpu.memory_space<smem>>, %arg3: memref<10xi32, #tpu.memory_space<smem>>) -> (i32, i32, i32, i32) {
    %0 = arith.index_cast %arg0 : i32 to index
    %1 = memref.load %arg2[%0] : memref<10xi32, #tpu.memory_space<smem>>
    %2 = arith.index_cast %arg0 : i32 to index
    %3 = memref.load %arg3[%2] : memref<10xi32, #tpu.memory_space<smem>>
    %4 = arith.muli %3, %arg1 : i32
    %c1_i32 = arith.constant 1 : i32
    %5 = arith.subi %c1_i32, %3 : i32
    %c0_i32 = arith.constant 0 : i32
    %6 = arith.muli %5, %c0_i32 : i32
    %7 = arith.addi %4, %6 : i32
    %c0_i32_0 = arith.constant 0 : i32
    %c0_i32_1 = arith.constant 0 : i32
    %c0_i32_2 = arith.constant 0 : i32
    return %1, %7, %c0_i32_0, %c0_i32_1 : i32, i32, i32, i32
  }
  func.func @transform_2(%arg0: i32, %arg1: i32, %arg2: memref<10xi32, #tpu.memory_space<smem>>, %arg3: memref<10xi32, #tpu.memory_space<smem>>) -> (i32, i32, i32, i32) {
    %0 = arith.index_cast %arg0 : i32 to index
    %1 = memref.load %arg2[%0] : memref<10xi32, #tpu.memory_space<smem>>
    %2 = arith.index_cast %arg0 : i32 to index
    %3 = memref.load %arg3[%2] : memref<10xi32, #tpu.memory_space<smem>>
    %4 = arith.muli %3, %arg1 : i32
    %c1_i32 = arith.constant 1 : i32
    %5 = arith.subi %c1_i32, %3 : i32
    %c0_i32 = arith.constant 0 : i32
    %6 = arith.muli %5, %c0_i32 : i32
    %7 = arith.addi %4, %6 : i32
    %c0_i32_0 = arith.constant 0 : i32
    %c0_i32_1 = arith.constant 0 : i32
    %c0_i32_2 = arith.constant 0 : i32
    return %1, %7, %c0_i32_0, %c0_i32_1 : i32, i32, i32, i32
  }
  func.func @transform_3(%arg0: i32, %arg1: i32, %arg2: memref<10xi32, #tpu.memory_space<smem>>, %arg3: memref<10xi32, #tpu.memory_space<smem>>) -> (i32, i32) {
    %c0_i32 = arith.constant 0 : i32
    %c0_i32_0 = arith.constant 0 : i32
    return %arg0, %c0_i32 : i32, i32
  }
  func.func @transform_4(%arg0: i32, %arg1: i32, %arg2: memref<10xi32, #tpu.memory_space<smem>>, %arg3: memref<10xi32, #tpu.memory_space<smem>>) -> (i32, i32) {
    %c0_i32 = arith.constant 0 : i32
    %c0_i32_0 = arith.constant 0 : i32
    return %arg0, %c0_i32 : i32, i32
  }
}

</mosaic_0001>

<bundles_post_ra>
// kernel: fused_moe_forward.1
= control target key start
LH: loop header
LB: loop body
LE: loop exit
PB: predicated region body
PF: predicated region fallthrough
CT: control target
= control target key end

     0   :  { %s1192_s0 = inlined_call_operand.vmem [shape: s32[10], index: 0, kind: input, shape index: {}]   ;;  %s1193_s2 = inlined_call_operand.vmem [shape: bf16[320,128], index: 2, kind: input, shape index: {}]   ;;  %s1194_s3 = inlined_call_operand.vmem [shape: bf16[8,1,128,256], index: 3, kind: input, shape index: {}]   ;;  %s1195_s4 = inlined_call_operand.vmem [shape: bf16[8,1,128,128], index: 4, kind: input, shape index: {}]   ;;  %s1196_s5 = inlined_call_operand.vmem [shape: f32[320,1], index: 5, kind: input, shape index: {}]   ;;  %s1197_s6 = inlined_call_operand.vmem [shape: f32[320,128], index: 6, kind: output, shape index: {}]   ;;  %s1198_s1 = inlined_call_operand.vmem [shape: s32[10], index: 1, kind: input, shape index: {}]  }
   0x1   :  { %s11_s23 = sshll.u32 %s1192_s0, 4  ;;  %s15_s26 = sshll.u32 %s1198_s1, 4  ;;  %s12_s23 = int_to_ptr.vmem [resolvable:$true] %s11_s23  ;;  %s16_s26 = int_to_ptr.vmem [resolvable:$true] %s15_s26 }
   0x2   :  { %s1012_s27 = scalar_lea.vmem %s12_s23, 16  ;;  %p1017_p1 = scmp.lt.s32.totalorder %s12_s23, %s12_s23 }
   0x3   :  { %p1013_p0 = scmp.ne.s32.totalorder %s12_s23, %s1012_s27  ;;  %p1018_p2 = scmp.lt.s32.totalorder %s1012_s27, %s1012_s27 }
   0x5   :  { %p1019_p3 = por %p1018_p2, %p1017_p1 }
   0x7   :  { %p1020_p4 = pnand %p1019_p3, %p1013_p0 }
   0x9   :  { %1023 = shalt.err (!%p1020_p4)  }
   0xa   :  { %s1062_s28 = smov [#allocation4]   ;;  %s1024_s29 = scalar_lea.vmem %s16_s26, 16 }
   0xb   :  { %14 = dma.vmem_to_smem %s12_s23, 16, %s1062_s28, [#allocation3] }
   0xc   :  { %p1025_p5 = scmp.ne.s32.totalorder %s16_s26, %s1024_s29  ;;  %p1029_p6 = scmp.lt.s32.totalorder %s16_s26, %s16_s26 }
   0xd   :  { %p1030_p7 = scmp.lt.s32.totalorder %s1024_s29, %s1024_s29 }
   0xf   :  { %p1031_p8 = por %p1030_p7, %p1029_p6 }
  0x11   :  { %p1032_p9 = pnand %p1031_p8, %p1025_p5 }
  0x13   :  { %1035 = shalt.err (!%p1032_p9)  }
  0x14   :  { %s1063_s0 = smov [#allocation5]  }
  0x15   :  { %18 = dma.vmem_to_smem %s16_s26, 16, %s1063_s0, [#allocation3] }
  0x16   :  { %1048 = dma.done.wait [#allocation3], 32 }
  0x17   :  { %1049 = vsyncadd [#allocation3], 4294967264 }
  0x18   :  { %20 = sfence }
  0x19   :  { %s1106_s1 = smov 0   ;;  %s1108_s30 = smov 0  }
  0x1a   :  { %s1110_s7 = smov 0  }
  0x1b LB: > { %s38_s8 = sadd.s32 1, %s1056_s30  ;;  %p857_p10 = scmp.ge.s32.totalorder %s1060_s7, 1  ;;  %s1060_s7 = sphi %s1110_s7, %s26_s7   ;;  %s1056_s30 = sphi %s1108_s30, %s1200_s30   ;;  %s1052_s1 = sphi %s1106_s1, %s1199_s1  }
  0x1c   : > { %p40_p11 = scmp.ge.s32.totalorder %s38_s8, 10  ;;  %p254_p12 = scmp.lt.s32.totalorder %s1060_s7, 11 }
  0x1e   : > { %s1202_s8 = smov (%p40_p11, %s38_s8), 0  ;;  %p255_p13 = pnand %p857_p10, %p254_p12 }
  0x1f   : > { %s858_s9 = sshll.u32 (!%p255_p13), %s1052_s1, 2  ;;  %s315_s10 = sld [smem:[#allocation4 + %s1052_s1]] (!%p255_p13) }
  0x20   : > { %258 = sbr.rel (%p255_p13) target bundleno = 552 (0x228), region = 36  ;;  %p310_p0 = scmp.lt.s32.totalorder (!%p255_p13), %s858_s9, 39 }
  0x21   : > { %s330_s11 = sld [smem:[#allocation4 + %s1052_s1]] (!%p255_p13) }
  0x22   : > { %s358_s12 = sld [smem:[#allocation5 + %s1052_s1]] (!%p255_p13) }
  0x25   : > { %p318_p1 = scmp.lt.s32.totalorder (!%p255_p13), %s315_s10, 7 }
  0x27   : > { %s1204_s9 = smov (!%p310_p0, %s858_s9), 39  ;;  %p333_p2 = scmp.lt.s32.totalorder %s330_s11, 7 }
  0x28   : > { %s859_s13 = sshll.u32 %s1204_s9, 2  ;;  %s865_s14 = sshll.u32 %s1204_s9, 3 }
  0x29   : > { %s1127_s17 = scalar_lea.vmem %s1193_s2, %s859_s13  ;;  %s1132_s20 = scalar_lea.vmem %s1196_s5, %s865_s14 }
  0x2a   : > { %s1206_s10 = smov (!%p318_p1, %s315_s10), 7  ;;  %s1208_s11 = smov (!%p333_p2, %s330_s11), 7 }
  0x2b   : > { %s901_s21 = sshll.u32 %s1206_s10, 7  ;;  %s1137_s24 = scalar_lea.vmem %s1197_s6, %s865_s14 }
  0x2c   : > { %s1142_s27 = scalar_lea.vmem %s1194_s3, %s901_s21  ;;  %s902_s28 = sshll.u32 %s1208_s11, 6 }
  0x2d   : > { %s1147_s1 = scalar_lea.vmem %s1195_s4, %s902_s28  ;;  %p868_p3 = scmp.eq.s32.totalorder %s358_s12, 0 }
  0x2e   : > { %v962_v0 = vld [vmem:[%s1142_s27 + $0x4] ss:$8 sps:$4 sm:$0xff] (!%p868_p3)   ;;  %v964_v1 = vld [vmem:[%s1142_s27] ss:$8 sps:$4 sm:$0xff] (!%p868_p3)   ;;  %v1064_v2 = vmov (!%p868_p3), 0   ;;  %v990_v21 = vld [vmem:[%s1147_s1 + $0x10] sm:$0xff] (!%p868_p3)  }
  0x2f   : > { %362 = sbr.rel (%p868_p3) target bundleno = 552 (0x228), region = 40  ;;  %515 = vmatprep.mubr.bf16.mxu0 (!%p868_p3), %v1064_v2  ;;  %961 = vset.pattern.permute.xlu1 (!%p868_p3), %v1064_v2  ;;  %v965_v3 = vld [vmem:[%s1142_s27 + $0x14] ss:$8 sps:$4 sm:$0xff] (!%p868_p3)   ;;  %v967_v4 = vld [vmem:[%s1142_s27 + $0x10] ss:$8 sps:$4 sm:$0xff] (!%p868_p3)   ;;  %v986_v17 = vld [vmem:[%s1127_s17] sm:$0xff] (!%p868_p3)  }
  0x30   : > { %483 = vmatprep.subr.bf16.mxu0 (!%p868_p3), %v962_v0  ;;  %960 = vset.pattern.permute.xlu0 (!%p868_p3), %v1064_v2  ;;  %v968_v5 = vld [vmem:[%s1142_s27 + $0x24] ss:$8 sps:$4 sm:$0xff] (!%p868_p3)   ;;  %v970_v6 = vld [vmem:[%s1142_s27 + $0x20] ss:$8 sps:$4 sm:$0xff] (!%p868_p3)   ;;  %v971_v7 = vld [vmem:[%s1142_s27 + $0x34] ss:$8 sps:$4 sm:$0xff] (!%p868_p3)  }
  0x31   : > { %484 = vmatpush1.bf16.msra.mxu0 (!%p868_p3), %v964_v1  ;;  %v973_v8 = vld [vmem:[%s1142_s27 + $0x30] ss:$8 sps:$4 sm:$0xff] (!%p868_p3)   ;;  %v974_v9 = vld [vmem:[%s1142_s27 + $0x44] ss:$8 sps:$4 sm:$0xff] (!%p868_p3)   ;;  %v976_v10 = vld [vmem:[%s1142_s27 + $0x40] ss:$8 sps:$4 sm:$0xff] (!%p868_p3)  }
  0x32   : > { %485 = vmatprep.subr.bf16.mxu0 (!%p868_p3), %v965_v3  ;;  %v977_v11 = vld [vmem:[%s1142_s27 + $0x54] ss:$8 sps:$4 sm:$0xff] (!%p868_p3)   ;;  %v979_v12 = vld [vmem:[%s1142_s27 + $0x50] ss:$8 sps:$4 sm:$0xff] (!%p868_p3)   ;;  %v980_v13 = vld [vmem:[%s1142_s27 + $0x64] ss:$8 sps:$4 sm:$0xff] (!%p868_p3)  }
  0x33   : > { %v982_v14 = vld [vmem:[%s1142_s27 + $0x60] ss:$8 sps:$4 sm:$0xff] (!%p868_p3)   ;;  %v983_v15 = vld [vmem:[%s1142_s27 + $0x74] ss:$8 sps:$4 sm:$0xff] (!%p868_p3)   ;;  %v985_v16 = vld [vmem:[%s1142_s27 + $0x70] ss:$8 sps:$4 sm:$0xff] (!%p868_p3)  }
  0x34   : > { %v987_v18 = vld [vmem:[%s1127_s17 + $0x8] sm:$0xff] (!%p868_p3)   ;;  %v988_v19 = vld [vmem:[%s1147_s1] sm:$0xff] (!%p868_p3)   ;;  %v991_v22 = vld [vmem:[%s1147_s1 + $0x18] sm:$0xff] (!%p868_p3)  }
  0x35   : > { %486 = vmatpush1.bf16.msra.mxu0 (!%p868_p3), %v967_v4  ;;  %913 = vmatprep.subr.bf16.mxu1 (!%p868_p3), %v988_v19  ;;  %v989_v20 = vld [vmem:[%s1147_s1 + $0x8] sm:$0xff] (!%p868_p3)   ;;  %v992_v23 = vld [vmem:[%s1147_s1 + $0x20] sm:$0xff] (!%p868_p3)   ;;  %v994_v25 = vld [vmem:[%s1147_s1 + $0x30] sm:$0xff] (!%p868_p3)  }
  0x36   : > { %487 = vmatprep.subr.bf16.mxu0 %v968_v5  ;;  %914 = vmatpush3.bf16.msra.mxu1 %v988_v19  ;;  %v993_v24 = vld [vmem:[%s1147_s1 + $0x28] sm:$0xff]   ;;  %v995_v26 = vld [vmem:[%s1147_s1 + $0x38] sm:$0xff]   ;;  %v700_v27 = vld [vmem:[%s1132_s20 + $0x10] sm:$0xff] }
  0x37   : > { %915 = vmatprep.subr.bf16.mxu1 %v989_v20  ;;  %v698_v28 = vld [vmem:[%s1132_s20] sm:$0xff]  ;;  %718 = vperm.xlu1 %961, %v700_v27   ;;  %v701_v29 = vld [vmem:[%s1132_s20 + $0x18] sm:$0xff]  ;;  %v699_v30 = vld [vmem:[%s1132_s20 + $0x8] sm:$0xff] }
  0x38   : > { %708 = vperm.xlu0 %960, %v698_v28  }
  0x39   : > { %488 = vmatpush1.bf16.msra.mxu0 %v970_v6 }
  0x3a   : > { %489 = vmatprep.subr.bf16.mxu0 %v971_v7  ;;  %916 = vmatpush3.bf16.msra.mxu1 %v989_v20 }
  0x3b   : > { %917 = vmatprep.subr.bf16.mxu1 %v990_v21  ;;  %723 = vperm.xlu1 %961, %v701_v29  }
  0x3c   : > { %713 = vperm.xlu0 %960, %v699_v30  }
  0x3d   : > { %490 = vmatpush1.bf16.msra.mxu0 %v973_v8 }
  0x3e   : > { %491 = vmatprep.subr.bf16.mxu0 %v974_v9  ;;  %918 = vmatpush3.bf16.msra.mxu1 %v990_v21 }
  0x3f   : > { %919 = vmatprep.subr.bf16.mxu1 %v991_v22 }
  0x41   : > { %492 = vmatpush1.bf16.msra.mxu0 %v976_v10 }
  0x42   : > { %493 = vmatprep.subr.bf16.mxu0 %v977_v11  ;;  %920 = vmatpush3.bf16.msra.mxu1 %v991_v22 }
  0x43   : > { %921 = vmatprep.subr.bf16.mxu1 %v992_v23 }
  0x45   : > { %494 = vmatpush1.bf16.msra.mxu0 %v979_v12 }
  0x46   : > { %495 = vmatprep.subr.bf16.mxu0 %v980_v13  ;;  %922 = vmatpush3.bf16.msra.mxu1 %v992_v23 }
  0x47   : > { %923 = vmatprep.subr.bf16.mxu1 %v993_v24 }
  0x49   : > { %496 = vmatpush1.bf16.msra.mxu0 %v982_v14 }
  0x4a   : > { %497 = vmatprep.subr.bf16.mxu0 %v983_v15  ;;  %924 = vmatpush3.bf16.msra.mxu1 %v993_v24 }
  0x4b   : > { %925 = vmatprep.subr.bf16.mxu1 %v994_v25 }
  0x4d   : > { %498 = vmatpush1.bf16.msra.mxu0 %v985_v16 }
  0x4e   : > { %926 = vmatpush3.bf16.msra.mxu1 %v994_v25 }
  0x4f   : > { %927 = vmatprep.subr.bf16.mxu1 %v995_v26 }
  0x50   : > { %516 = vmatmul.mubr.bf16.vlgmr.msra.gmra.mrb[0].mxu0 %v986_v17 }
  0x51   : > { %525 = vmatprep.mubr.bf16.mxu0 %v1064_v2 }
  0x52   : > { %928 = vmatpush3.bf16.msra.mxu1 %v995_v26 }
  0x58   : > { %526 = vmatmul.mubr.bf16.gmra.mrb[4].mxu0 %v987_v18 }
  0xb6   : > { %v719_v1 = vpop.permute.xlu1 %718 }
  0xb7   : > { %v709_v2 = vpop.permute.xlu0 %708 }
  0xba   : > { %v724_v6 = vpop.permute.xlu1 %723 }
  0xbb   : > { %v714_v9 = vpop.permute.xlu0 %713 }
 0x123   : > { %v517_v31 = vpop.f32.mrb[0].mxu0 }
 0x124   : > { %v887_v32 = vmul.f32 -1.442695, %v517_v31  ;;  %v519_v33 = vpop.f32.mrb[1].mxu0 }
 0x125   : > { %v521_v34 = vpop.f32.mrb[2].mxu0 }
 0x126   : > { %996 = vpow2.f32 %v887_v32  ;;  %v888_v35 = vmul.f32 -1.442695, %v521_v34  ;;  %v523_v36 = vpop.f32.mrb[3].mxu0 }
 0x128   : > { %998 = vpow2.f32 %v888_v35 }
 0x12b   : > { %v527_v37 = vpop.f32.mrb[4].mxu0 }
 0x12c   : > { %v889_v38 = vmul.f32 -1.442695, %v527_v37  ;;  %v529_v39 = vpop.f32.mrb[5].mxu0 }
 0x12d   : > { %v531_v40 = vpop.f32.mrb[6].mxu0 }
 0x12e   : > { %1000 = vpow2.f32 %v889_v38  ;;  %v890_v41 = vmul.f32 -1.442695, %v531_v40  ;;  %v533_v42 = vpop.f32.mrb[7].mxu0 }
 0x130   : > { %v997_v43 = vpop.eup %996  ;;  %1002 = vpow2.f32 %v890_v41 }
 0x131   : > { %v548_v44 = vadd.f32 1.0, %v997_v43 }
 0x132   : > { %v999_v45 = vpop.eup %998 }
 0x133   : > { %1004 = vrcp.f32 %v548_v44  ;;  %v549_v46 = vadd.f32 1.0, %v999_v45 }
 0x135   : > { %1006 = vrcp.f32 %v549_v46 }
 0x138   : > { %v1001_v47 = vpop.eup %1000 }
 0x139   : > { %v550_v48 = vadd.f32 1.0, %v1001_v47 }
 0x13a   : > { %v1003_v49 = vpop.eup %1002 }
 0x13b   : > { %1008 = vrcp.f32 %v550_v48  ;;  %v551_v50 = vadd.f32 1.0, %v1003_v49 }
 0x13d   : > { %v1005_v51 = vpop.eup %1004  ;;  %1010 = vrcp.f32 %v551_v50 }
 0x13e   : > { %v560_v52 = vmul.f32 %v1005_v51, %v517_v31 }
 0x13f   : > { %v1007_v53 = vpop.eup %1006 }
 0x140   : > { %v564_v54 = vmul.f32 %v560_v52, %v519_v33  ;;  %v561_v55 = vmul.f32 %v1007_v53, %v521_v34 }
 0x142   : > { %v565_v56 = vmul.f32 %v561_v55, %v523_v36 }
 0x144   : > { %v572_v57 = vpack.c.bf16 %v565_v56, %v564_v54 }
 0x145   : > { %v1009_v58 = vpop.eup %1008 }
 0x146   : > { %v562_v59 = vmul.f32 %v1009_v58, %v527_v37  ;;  %929 = vmatprep.mubr.bf16.mxu1 %v572_v57 }
 0x147   : > { %v1011_v60 = vpop.eup %1010 }
 0x148   : > { %v566_v61 = vmul.f32 %v562_v59, %v529_v39  ;;  %v563_v62 = vmul.f32 %v1011_v60, %v531_v40 }
 0x14a   : > { %v567_v63 = vmul.f32 %v563_v62, %v533_v42 }
 0x14c   : > { %v573_v0 = vpack.c.bf16 %v567_v63, %v566_v61 }
 0x14e   : > { %930 = vmatmul.mubr.bf16.vlgmr.msra.gmra.mrb[0].mxu1 %v573_v0 }
 0x221   : > { %v931_v3 = vpop.f32.mrb[0].mxu1 }
 0x222   : > { %v728_v4 = vmul.f32 %v931_v3, %v719_v1  ;;  %v672_v5 = vpop.f32.mrb[1].mxu1 }
 0x223   : > { %v726_v7 = vmul.f32 %v709_v2, %v672_v5  ;;  %v932_v8 = vpop.f32.mrb[2].mxu1 }
 0x224   : > { %732 = vst [vmem:[%s1137_s24 + $0x10] sm:$0xff] %v728_v4  ;;  %v729_v10 = vmul.f32 %v932_v8, %v724_v6  ;;  %v675_v11 = vpop.f32.mrb[3].mxu1 }
 0x225   : > { %730 = vst [vmem:[%s1137_s24] sm:$0xff] %v726_v7  ;;  %v727_v12 = vmul.f32 %v714_v9, %v675_v11 }
 0x226   : > { %733 = vst [vmem:[%s1137_s24 + $0x18] sm:$0xff] %v729_v10 }
 0x227   : > { %731 = vst [vmem:[%s1137_s24 + $0x8] sm:$0xff] %v727_v12 }
 0x228 PF: > { %s26_s7 = sadd.s32 1, %s1060_s7   ;;  %s1199_s1 = smov %s1056_s30 }
 0x229   : > { %p23_p4 = scmp.ge.s32.totalorder %s26_s7, 12   ;;  %s1200_s30 = smov %s1202_s8 }
 0x22b   :  { %25 = sbr.rel (!%p23_p4) target bundleno = 27 (0x1b), region = 87 }

</bundles_post_ra>
